<compile_context>
chip_gen: v5e
topology: v5e:2x2
jax: 0.10.0
libtpu: 0.0.40
codegen_flags: <defaults>
</compile_context>

<pallas_src>
import jax
import jax.numpy as jnp
import numpy as np
from jax import lax
from jax.experimental import pallas as pl
from jax.experimental.pallas import tpu as pltpu


# ----------------------------------------------------------------------------
# Pallas kernel: one batch element per grid step; everything lives in VMEM.
# ----------------------------------------------------------------------------
def _c2c_kernel(
    x_ref,                                   # (1, Cin, HW)   channels-first
    wd_ref, sd_ref, bd_ref,                  # convDwn1|convDwn2 fused
    wtc_ref, btc_ref,                        # toClass, block-diagonal
    ccmask_ref, ccbias_ref,                  # class-to-class mask + biases
    wua_ref, sua_ref, bua_ref,               # convUp first conv (block-diag)
    wub_ref, bub_ref,                        # convUp second conv (gamma/beta folded)
    wfa_ref, wfb_ref, sf_ref, bf_ref,        # fea_fuse (split over concat axis)
    fuse_ref, cc_ref,                        # outputs
):
    x = x_ref[0]                                           # (Cin, HW)
    ncls = ccmask_ref.shape[0] // 2
    hw = x.shape[1]

    # --- convDwn1 | convDwn2: one (2*Cout, Cin) @ (Cin, HW) matmul + BN + ReLU.
    fea = jnp.dot(wd_ref[...], x, preferred_element_type=jnp.float32)
    fea = jnp.maximum(fea * sd_ref[...] + bd_ref[...], 0.0)           # (2Co, HW)

    # --- toClass on both branches via a block-diagonal weight: one matmul.
    logits = (jnp.dot(wtc_ref[...], fea, preferred_element_type=jnp.float32)
              + btc_ref[...])                                         # (2C, HW)

    def softmax_over_classes(l):             # class axis == sublane axis
        m = jnp.max(l, axis=0, keepdims=True)
        e = jnp.exp(l - m)
        return e / jnp.sum(e, axis=0, keepdims=True)

    cls_ha = softmax_over_classes(logits[:ncls])                      # (C, HW)
    cls_wa = softmax_over_classes(logits[ncls:])                      # (C, HW)
    cls_cat = jnp.concatenate([cls_ha, cls_wa], axis=0)               # (2C, HW)

    # --- One fused Gram: the two diagonal (C, C) blocks are the class-to-class
    #     affinities of the two branches; off-diagonal blocks are masked away.
    gram = lax.dot_general(cls_cat, cls_cat, (((1,), (1,)), ((), ())),
                           preferred_element_type=jnp.float32)        # (2C, 2C)
    cc = (jax.nn.sigmoid(jnp.maximum(gram, 0.0)) * ccmask_ref[...]
          + ccbias_ref[...])                                          # (2C, 2C)
    cc_ref[0, 0] = cc[:ncls, :ncls]                                   # cch
    cc_ref[0, 1] = cc[ncls:, ncls:]                                   # ccw

    # --- Pool before reproject: mean is linear, so take the per-class spatial
    #     mean first (a (1, 2C) row) and reproject that instead of (HW, C).
    ones_row = jnp.full((1, hw), 1.0 / hw, dtype=jnp.float32)
    m_row = lax.dot_general(ones_row, cls_cat, (((1,), (1,)), ((), ())),
                            preferred_element_type=jnp.float32)       # (1, 2C)
    p_row = lax.dot_general(m_row, cc, (((1,), (1,)), ((), ())),
                            preferred_element_type=jnp.float32)       # (1, 2C)

    # --- convUp1 | convUp2 fused: block-diagonal first conv + BN + ReLU, then
    #     the second convs stacked with gamma/beta already folded in.
    y = jnp.dot(p_row, wua_ref[...], preferred_element_type=jnp.float32)
    y = jnp.maximum(y * sua_ref[...] + bua_ref[...], 0.0)             # (1, 2Co)
    fea_hwa = (jnp.dot(y, wub_ref[...], preferred_element_type=jnp.float32)
               + bub_ref[...])                                        # (1, Cin)

    # --- fea_fuse on cat([x * fea_hwa, x], channel): the per-channel scaling
    #     folds into the first half of the 1x1 conv weight, so one
    #     (Cin, Cin) @ (Cin, HW) matmul does it all.  BN + ReLU after.
    w_eff = wfa_ref[...] * fea_hwa + wfb_ref[...]                     # (Cin, Cin)
    fused = jnp.dot(w_eff, x, preferred_element_type=jnp.float32)
    fused = jnp.maximum(fused * sf_ref[...] + bf_ref[...], 0.0)       # (Cin, HW)
    fuse_ref[0] = fused                                               # lane-dense


_PARAM_ORDER = [
    "wd", "sd", "bd",
    "wtc", "btc",
    "ccmask", "ccbias",
    "wua", "sua", "bua",
    "wub", "bub",
    "wfa", "wfb", "sf", "bf",
]


# ----------------------------------------------------------------------------
# Host-side parameter fusion (pure layout/algebra, done once outside the kernel)
# ----------------------------------------------------------------------------
def prepare_params(p):
    f32 = jnp.float32
    ncls = p["bias1"].shape[0]

    def col(v):                       # (1, C) row -> (C, 1) column
        return jnp.reshape(v, (-1, 1)).astype(f32)

    def blockdiag(a, b):
        za = jnp.zeros((a.shape[0], b.shape[1]), f32)
        zb = jnp.zeros((b.shape[0], a.shape[1]), f32)
        top = jnp.concatenate([a, za], axis=1)
        bot = jnp.concatenate([zb, b], axis=1)
        return jnp.concatenate([top, bot], axis=0)

    k = {}
    # convDwn1 | convDwn2: channels-first (2*Cout, Cin) weight; folded BN cols.
    k["wd"] = jnp.concatenate([p["wd1"].T, p["wd2"].T], axis=0)
    k["sd"] = jnp.concatenate([col(p["bn1s"]), col(p["bn2s"])], axis=0)
    k["bd"] = jnp.concatenate([col(p["bn1b"]), col(p["bn2b"])], axis=0)
    # toClass (shared weights) applied to both branches: block-diagonal weight.
    k["wtc"] = blockdiag(p["wtc"].T, p["wtc"].T)                # (2C, 2*Cout)
    k["btc"] = jnp.concatenate([col(p["btc"]), col(p["btc"])], axis=0)
    # class-to-class: mask selecting diagonal blocks + block-diagonal biases.
    eye_blk = jnp.ones((ncls, ncls), f32)
    k["ccmask"] = blockdiag(eye_blk, eye_blk)
    k["ccbias"] = blockdiag(p["bias1"], p["bias2"])
    # convUp first conv (block-diag) + BN rows; second conv with gamma/beta folded.
    k["wua"] = blockdiag(p["wu1a"], p["wu2a"])                  # (2C, 2*Cout)
    k["sua"] = jnp.concatenate([p["bnu1s"], p["bnu2s"]], axis=1)  # (1, 2*Cout)
    k["bua"] = jnp.concatenate([p["bnu1b"], p["bnu2b"]], axis=1)
    g = p["gamma"][0, 0]
    b = p["beta"][0, 0]
    k["wub"] = jnp.concatenate([g * p["wu1b"], b * p["wu2b"]], axis=0)  # (2Co, Cin)
    k["bub"] = g * p["bu1b"] + b * p["bu2b"]                            # (1, Cin)
    # fea_fuse: split weight, channels-first; folded BN as columns.
    k["wfa"] = p["wfa"].T
    k["wfb"] = p["wfb"].T
    k["sf"] = col(p["bnfs"])
    k["bf"] = col(p["bnfb"])
    return k


# ----------------------------------------------------------------------------
# Wrapper
# ----------------------------------------------------------------------------
def c2c_forward(x_nchw, p):
    n, cin, h, w = x_nchw.shape
    hw = h * w
    ncls = p["bias1"].shape[0]
    k = prepare_params(p)

    # Pure reshape (no transpose): NCHW -> (N, Cin, HW), lane-dense on HW.
    x = x_nchw.reshape(n, cin, hw).astype(jnp.float32)

    def full_spec(arr):
        zeros = (0,) * arr.ndim
        return pl.BlockSpec(arr.shape, lambda b, _z=zeros: _z)

    args = [x] + [k[name] for name in _PARAM_ORDER]
    in_specs = [pl.BlockSpec((1, cin, hw), lambda b: (b, 0, 0))]
    in_specs += [full_spec(k[name]) for name in _PARAM_ORDER]

    out_shape = (
        jax.ShapeDtypeStruct((n, cin, hw), jnp.float32),
        jax.ShapeDtypeStruct((n, 2, ncls, ncls), jnp.float32),
    )
    out_specs = (
        pl.BlockSpec((1, cin, hw), lambda b: (b, 0, 0)),
        pl.BlockSpec((1, 2, ncls, ncls), lambda b: (b, 0, 0, 0)),
    )

    fuse_flat, cc = pl.pallas_call(
        _c2c_kernel,
        grid=(n,),
        in_specs=in_specs,
        out_specs=out_specs,
        out_shape=out_shape,
        compiler_params=pltpu.CompilerParams(
            dimension_semantics=("parallel",)),
    )(*args)

    fea_fuse = fuse_flat.reshape(n, cin, h, w)      # already NCHW order
    return fea_fuse, cc[:, 0], cc[:, 1]


# ----------------------------------------------------------------------------
# Deterministic synthetic parameters (eval-mode BN folded into scale/shift).
# ----------------------------------------------------------------------------
def init_params(key, in_fea, out_fea, num_class):
    ks = iter(jax.random.split(key, 32))

    def wmat(shape, scale=0.1):
        return scale * jax.random.normal(next(ks), shape, jnp.float32)

    def bn_fold(c):
        g = jax.random.uniform(next(ks), (1, c), jnp.float32, 0.5, 1.5)
        b = 0.1 * jax.random.normal(next(ks), (1, c), jnp.float32)
        mean = jnp.zeros((1, c), jnp.float32)      # fresh running stats
        var = jnp.ones((1, c), jnp.float32)
        scale = g / jnp.sqrt(var + 1e-5)
        shift = b - mean * scale
        return scale, shift

    xav = float(np.sqrt(6.0 / (num_class + num_class)))

    p = {}
    # convDwn1 / convDwn2 (1x1, no bias) + folded BN  -- weights stored (Cin, Cout)
    p["wd1"] = wmat((in_fea, out_fea));  p["bn1s"], p["bn1b"] = bn_fold(out_fea)
    p["wd2"] = wmat((in_fea, out_fea));  p["bn2s"], p["bn2b"] = bn_fold(out_fea)
    # toClass (shared between both branches)
    p["wtc"] = wmat((out_fea, num_class))
    p["btc"] = 0.1 * jax.random.normal(next(ks), (1, num_class), jnp.float32)
    # bias1 / bias2 : xavier uniform
    p["bias1"] = jax.random.uniform(next(ks), (num_class, num_class),
                                    jnp.float32, -xav, xav)
    p["bias2"] = jax.random.uniform(next(ks), (num_class, num_class),
                                    jnp.float32, -xav, xav)
    # convUp1 / convUp2
    p["wu1a"] = wmat((num_class, out_fea)); p["bnu1s"], p["bnu1b"] = bn_fold(out_fea)
    p["wu1b"] = wmat((out_fea, in_fea))
    p["bu1b"] = 0.1 * jax.random.normal(next(ks), (1, in_fea), jnp.float32)
    p["wu2a"] = wmat((num_class, out_fea)); p["bnu2s"], p["bnu2b"] = bn_fold(out_fea)
    p["wu2b"] = wmat((out_fea, in_fea))
    p["bu2b"] = 0.1 * jax.random.normal(next(ks), (1, in_fea), jnp.float32)
    # gamma / beta (torch.ones(1))
    p["gamma"] = jnp.ones((1, 1), jnp.float32)
    p["beta"] = jnp.ones((1, 1), jnp.float32)
    # fea_fuse: conv(2*Cin -> Cin) split over the concat axis, + folded BN
    p["wfa"] = wmat((in_fea, in_fea))      # acts on fea_hwa_aug
    p["wfb"] = wmat((in_fea, in_fea))      # acts on input_fea
    p["bnfs"], p["bnfb"] = bn_fold(in_fea)
    return p


# ----------------------------------------------------------------------------
# Pure-JAX reference (un-fused math, mirrors the PyTorch module) for checking.
# ----------------------------------------------------------------------------
def reference_forward(x_nchw, p):
    n, cin, h, w = x_nchw.shape
    hw = h * w
    x = jnp.transpose(x_nchw, (0, 2, 3, 1)).reshape(n, hw, cin).astype(jnp.float32)

    def one(xs):
        cbr = lambda inp, wgt, s, b: jnp.maximum(inp @ wgt * s + b, 0.0)
        fea_ha = cbr(xs, p["wd1"], p["bn1s"], p["bn1b"])
        fea_wa = cbr(xs, p["wd2"], p["bn2s"], p["bn2b"])
        cls_ha = jax.nn.softmax(fea_ha @ p["wtc"] + p["btc"], axis=-1)
        cls_wa = jax.nn.softmax(fea_wa @ p["wtc"] + p["btc"], axis=-1)
        # cls here is (HW, C) = torch's (C, HW) transposed, so cls.T @ cls
        # equals torch's matmul(cls, cls.transpose(1, 2)).
        cch = jax.nn.sigmoid(jnp.maximum(cls_ha.T @ cls_ha, 0.0)) + p["bias1"]
        ccw = jax.nn.sigmoid(jnp.maximum(cls_wa.T @ cls_wa, 0.0)) + p["bias2"]
        cls_ha2 = cls_ha @ cch.T
        cls_wa2 = cls_wa @ ccw.T

        def up(c2, wa, sa, ba, wb, bb):
            pooled = jnp.mean(c2, axis=0, keepdims=True)
            y = jnp.maximum(pooled @ wa * sa + ba, 0.0)
            return y @ wb + bb

        up1 = up(cls_ha2, p["wu1a"], p["bnu1s"], p["bnu1b"], p["wu1b"], p["bu1b"])
        up2 = up(cls_wa2, p["wu2a"], p["bnu2s"], p["bnu2b"], p["wu2b"], p["bu2b"])
        fea_hwa = p["gamma"][0, 0] * up1 + p["beta"][0, 0] * up2
        aug = xs * fea_hwa
        fused = jnp.maximum(
            (aug @ p["wfa"] + xs @ p["wfb"]) * p["bnfs"] + p["bnfb"], 0.0)
        return fused, cch, ccw

    fused, cch, ccw = jax.vmap(one)(x)
    fea_fuse = jnp.transpose(fused.reshape(n, h, w, cin), (0, 3, 1, 2))
    return fea_fuse, cch, ccw


if __name__ == "__main__":
    IN_FEA, OUT_FEA, NUM_CLASS = 8, 16, 8
    N, H, W = 2, 16, 16

    key = jax.random.PRNGKey(0)
    kx, kp = jax.random.split(key)
    x = jax.random.normal(kx, (N, IN_FEA, H, W), jnp.float32)
    params = init_params(kp, IN_FEA, OUT_FEA, NUM_CLASS)

    fuse, cch, ccw = c2c_forward(x, params)
    jax.block_until_ready((fuse, cch, ccw))

    rf, rc, rw = reference_forward(x, params)
    assert fuse.shape == (N, IN_FEA, H, W)
    assert cch.shape == (N, NUM_CLASS, NUM_CLASS)
    assert ccw.shape == (N, NUM_CLASS, NUM_CLASS)
    np.testing.assert_allclose(np.asarray(fuse), np.asarray(rf), rtol=5e-4, atol=5e-4)
    np.testing.assert_allclose(np.asarray(cch), np.asarray(rc), rtol=5e-4, atol=5e-4)
    np.testing.assert_allclose(np.asarray(ccw), np.asarray(rw), rtol=5e-4, atol=5e-4)

    print("KERNEL_OK")
</pallas_src>

<mosaic_0001>
module attributes {stable_mosaic.version = 11 : i64} {
  func.func @_c2c_kernel(%arg0: i32, %arg1: memref<1x8x256xf32, #tpu.memory_space<vmem>>, %arg2: memref<32x8xf32, #tpu.memory_space<vmem>>, %arg3: memref<32x1xf32, #tpu.memory_space<vmem>>, %arg4: memref<32x1xf32, #tpu.memory_space<vmem>>, %arg5: memref<16x32xf32, #tpu.memory_space<vmem>>, %arg6: memref<16x1xf32, #tpu.memory_space<vmem>>, %arg7: memref<16x16xf32, #tpu.memory_space<vmem>>, %arg8: memref<16x16xf32, #tpu.memory_space<vmem>>, %arg9: memref<16x32xf32, #tpu.memory_space<vmem>>, %arg10: memref<1x32xf32, #tpu.memory_space<vmem>>, %arg11: memref<1x32xf32, #tpu.memory_space<vmem>>, %arg12: memref<32x8xf32, #tpu.memory_space<vmem>>, %arg13: memref<1x8xf32, #tpu.memory_space<vmem>>, %arg14: memref<8x8xf32, #tpu.memory_space<vmem>>, %arg15: memref<8x8xf32, #tpu.memory_space<vmem>>, %arg16: memref<8x1xf32, #tpu.memory_space<vmem>>, %arg17: memref<8x1xf32, #tpu.memory_space<vmem>>, %arg18: memref<1x8x256xf32, #tpu.memory_space<vmem>>, %arg19: memref<1x2x8x8xf32, #tpu.memory_space<vmem>>) attributes {dimension_semantics = [#tpu.dimension_semantics<parallel>], iteration_bounds = array<i64: 2>, scalar_prefetch = 0 : i64, scratch_operands = 0 : i64, tpu.core_type = #tpu.core_type<tc>, window_params = [{transform_indices = @transform_0, window_bounds = array<i64: 1, 8, 256>}, {pipeline_mode = #tpu.pipeline_mode<synchronous>, transform_indices = @transform_1, window_bounds = array<i64: 32, 8>}, {pipeline_mode = #tpu.pipeline_mode<synchronous>, transform_indices = @transform_2, window_bounds = array<i64: 32, 1>}, {pipeline_mode = #tpu.pipeline_mode<synchronous>, transform_indices = @transform_3, window_bounds = array<i64: 32, 1>}, {pipeline_mode = #tpu.pipeline_mode<synchronous>, transform_indices = @transform_4, window_bounds = array<i64: 16, 32>}, {pipeline_mode = #tpu.pipeline_mode<synchronous>, transform_indices = @transform_5, window_bounds = array<i64: 16, 1>}, {pipeline_mode = #tpu.pipeline_mode<synchronous>, transform_indices = @transform_6, window_bounds = array<i64: 16, 16>}, {pipeline_mode = #tpu.pipeline_mode<synchronous>, transform_indices = @transform_7, window_bounds = array<i64: 16, 16>}, {pipeline_mode = #tpu.pipeline_mode<synchronous>, transform_indices = @transform_8, window_bounds = array<i64: 16, 32>}, {pipeline_mode = #tpu.pipeline_mode<synchronous>, transform_indices = @transform_9, window_bounds = array<i64: 1, 32>}, {pipeline_mode = #tpu.pipeline_mode<synchronous>, transform_indices = @transform_10, window_bounds = array<i64: 1, 32>}, {pipeline_mode = #tpu.pipeline_mode<synchronous>, transform_indices = @transform_11, window_bounds = array<i64: 32, 8>}, {pipeline_mode = #tpu.pipeline_mode<synchronous>, transform_indices = @transform_12, window_bounds = array<i64: 1, 8>}, {pipeline_mode = #tpu.pipeline_mode<synchronous>, transform_indices = @transform_13, window_bounds = array<i64: 8, 8>}, {pipeline_mode = #tpu.pipeline_mode<synchronous>, transform_indices = @transform_14, window_bounds = array<i64: 8, 8>}, {pipeline_mode = #tpu.pipeline_mode<synchronous>, transform_indices = @transform_15, window_bounds = array<i64: 8, 1>}, {pipeline_mode = #tpu.pipeline_mode<synchronous>, transform_indices = @transform_16, window_bounds = array<i64: 8, 1>}, {transform_indices = @transform_17, window_bounds = array<i64: 1, 8, 256>}, {transform_indices = @transform_18, window_bounds = array<i64: 1, 2, 8, 8>}]} {
    %c0 = arith.constant 0 : index
    %c0_0 = arith.constant 0 : index
    %c0_1 = arith.constant 0 : index
    %0 = vector.load %arg1[%c0, %c0_0, %c0_1] : memref<1x8x256xf32, #tpu.memory_space<vmem>>, vector<1x8x256xf32>
    %1 = vector.shape_cast %0 : vector<1x8x256xf32> to vector<8x256xf32>
    %c0_2 = arith.constant 0 : index
    %c0_3 = arith.constant 0 : index
    %2 = vector.load %arg2[%c0_2, %c0_3] : memref<32x8xf32, #tpu.memory_space<vmem>>, vector<32x8xf32>
    %cst = arith.constant dense<0.000000e+00> : vector<32x256xf32>
    %3 = tpu.matmul %2, %1, %cst {dimension_numbers = #tpu.dot_dimension_numbers<[1], [0], [0], [1], [0, 0, 1, 1], [], []>} : vector<32x8xf32>, vector<8x256xf32>, vector<32x256xf32> -> vector<32x256xf32>
    %c0_4 = arith.constant 0 : index
    %c0_5 = arith.constant 0 : index
    %4 = vector.load %arg3[%c0_4, %c0_5] : memref<32x1xf32, #tpu.memory_space<vmem>>, vector<32x1xf32>
    %5 = vector.broadcast %4 : vector<32x1xf32> to vector<32x256xf32>
    %6 = arith.mulf %3, %5 : vector<32x256xf32>
    %c0_6 = arith.constant 0 : index
    %c0_7 = arith.constant 0 : index
    %7 = vector.load %arg4[%c0_6, %c0_7] : memref<32x1xf32, #tpu.memory_space<vmem>>, vector<32x1xf32>
    %8 = vector.broadcast %7 : vector<32x1xf32> to vector<32x256xf32>
    %9 = arith.addf %6, %8 : vector<32x256xf32>
    %cst_8 = arith.constant 0.000000e+00 : f32
    %10 = vector.broadcast %cst_8 : f32 to vector<32x256xf32>
    %11 = arith.maximumf %9, %10 : vector<32x256xf32>
    %c0_9 = arith.constant 0 : index
    %c0_10 = arith.constant 0 : index
    %12 = vector.load %arg5[%c0_9, %c0_10] : memref<16x32xf32, #tpu.memory_space<vmem>>, vector<16x32xf32>
    %cst_11 = arith.constant dense<0.000000e+00> : vector<16x256xf32>
    %13 = tpu.matmul %12, %11, %cst_11 {dimension_numbers = #tpu.dot_dimension_numbers<[1], [0], [0], [1], [0, 0, 1, 1], [], []>} : vector<16x32xf32>, vector<32x256xf32>, vector<16x256xf32> -> vector<16x256xf32>
    %c0_12 = arith.constant 0 : index
    %c0_13 = arith.constant 0 : index
    %14 = vector.load %arg6[%c0_12, %c0_13] : memref<16x1xf32, #tpu.memory_space<vmem>>, vector<16x1xf32>
    %15 = vector.broadcast %14 : vector<16x1xf32> to vector<16x256xf32>
    %16 = arith.addf %13, %15 : vector<16x256xf32>
    %17 = vector.extract_strided_slice %16 {offsets = [0, 0], sizes = [8, 256], strides = [1, 1]} : vector<16x256xf32> to vector<8x256xf32>
    %cst_14 = arith.constant dense<0xFF800000> : vector<256xf32>
    %18 = vector.multi_reduction <maximumf>, %17, %cst_14 [0] : vector<8x256xf32> to vector<256xf32>
    %19 = vector.shape_cast %18 : vector<256xf32> to vector<1x256xf32>
    %20 = vector.broadcast %19 : vector<1x256xf32> to vector<8x256xf32>
    %21 = arith.subf %17, %20 : vector<8x256xf32>
    %22 = math.exp %21 : vector<8x256xf32>
    %cst_15 = arith.constant dense<0.000000e+00> : vector<256xf32>
    %23 = vector.multi_reduction <add>, %22, %cst_15 [0] : vector<8x256xf32> to vector<256xf32>
    %24 = vector.shape_cast %23 : vector<256xf32> to vector<1x256xf32>
    %25 = vector.broadcast %24 : vector<1x256xf32> to vector<8x256xf32>
    %26 = arith.divf %22, %25 : vector<8x256xf32>
    %27 = vector.extract_strided_slice %16 {offsets = [8, 0], sizes = [8, 256], strides = [1, 1]} : vector<16x256xf32> to vector<8x256xf32>
    %cst_16 = arith.constant dense<0xFF800000> : vector<256xf32>
    %28 = vector.multi_reduction <maximumf>, %27, %cst_16 [0] : vector<8x256xf32> to vector<256xf32>
    %29 = vector.shape_cast %28 : vector<256xf32> to vector<1x256xf32>
    %30 = vector.broadcast %29 : vector<1x256xf32> to vector<8x256xf32>
    %31 = arith.subf %27, %30 : vector<8x256xf32>
    %32 = math.exp %31 : vector<8x256xf32>
    %cst_17 = arith.constant dense<0.000000e+00> : vector<256xf32>
    %33 = vector.multi_reduction <add>, %32, %cst_17 [0] : vector<8x256xf32> to vector<256xf32>
    %34 = vector.shape_cast %33 : vector<256xf32> to vector<1x256xf32>
    %35 = vector.broadcast %34 : vector<1x256xf32> to vector<8x256xf32>
    %36 = arith.divf %32, %35 : vector<8x256xf32>
    %37 = tpu.concatenate %26, %36 in 0 : vector<8x256xf32>, vector<8x256xf32> -> vector<16x256xf32>
    %cst_18 = arith.constant dense<0.000000e+00> : vector<16x16xf32>
    %38 = tpu.matmul %37, %37, %cst_18 {dimension_numbers = #tpu.dot_dimension_numbers<[1], [1], [0], [0], [0, 0, 1, 0], [], []>} : vector<16x256xf32>, vector<16x256xf32>, vector<16x16xf32> -> vector<16x16xf32>
    %cst_19 = arith.constant 0.000000e+00 : f32
    %39 = vector.broadcast %cst_19 : f32 to vector<16x16xf32>
    %40 = arith.maximumf %38, %39 : vector<16x16xf32>
    %41 = arith.negf %40 : vector<16x16xf32>
    %42 = math.exp %41 : vector<16x16xf32>
    %cst_20 = arith.constant 1.000000e+00 : f32
    %43 = vector.broadcast %cst_20 : f32 to vector<16x16xf32>
    %44 = arith.addf %43, %42 : vector<16x16xf32>
    %45 = arith.divf %43, %44 : vector<16x16xf32>
    %c0_21 = arith.constant 0 : index
    %c0_22 = arith.constant 0 : index
    %46 = vector.load %arg7[%c0_21, %c0_22] : memref<16x16xf32, #tpu.memory_space<vmem>>, vector<16x16xf32>
    %47 = arith.mulf %45, %46 : vector<16x16xf32>
    %c0_23 = arith.constant 0 : index
    %c0_24 = arith.constant 0 : index
    %48 = vector.load %arg8[%c0_23, %c0_24] : memref<16x16xf32, #tpu.memory_space<vmem>>, vector<16x16xf32>
    %49 = arith.addf %47, %48 : vector<16x16xf32>
    %50 = vector.extract_strided_slice %49 {offsets = [0, 0], sizes = [8, 8], strides = [1, 1]} : vector<16x16xf32> to vector<8x8xf32>
    %c0_25 = arith.constant 0 : index
    %c0_26 = arith.constant 0 : index
    %c0_27 = arith.constant 0 : index
    %c0_28 = arith.constant 0 : index
    %51 = vector.load %arg19[%c0_25, %c0_26, %c0_27, %c0_28] : memref<1x2x8x8xf32, #tpu.memory_space<vmem>>, vector<1x1x8x8xf32>
    %52 = vector.shape_cast %51 : vector<1x1x8x8xf32> to vector<8x8xf32>
    %53 = vector.shape_cast %50 : vector<8x8xf32> to vector<1x1x8x8xf32>
    tpu.vector_store %arg19[%c0_25, %c0_26, %c0_27, %c0_28], %53 {strides = array<i32>} : memref<1x2x8x8xf32, #tpu.memory_space<vmem>>, vector<1x1x8x8xf32>,
    %54 = vector.extract_strided_slice %49 {offsets = [8, 8], sizes = [8, 8], strides = [1, 1]} : vector<16x16xf32> to vector<8x8xf32>
    %c0_29 = arith.constant 0 : index
    %c1 = arith.constant 1 : index
    %c0_30 = arith.constant 0 : index
    %c0_31 = arith.constant 0 : index
    %55 = vector.load %arg19[%c0_29, %c1, %c0_30, %c0_31] : memref<1x2x8x8xf32, #tpu.memory_space<vmem>>, vector<1x1x8x8xf32>
    %56 = vector.shape_cast %55 : vector<1x1x8x8xf32> to vector<8x8xf32>
    %57 = vector.shape_cast %54 : vector<8x8xf32> to vector<1x1x8x8xf32>
    tpu.vector_store %arg19[%c0_29, %c1, %c0_30, %c0_31], %57 {strides = array<i32>} : memref<1x2x8x8xf32, #tpu.memory_space<vmem>>, vector<1x1x8x8xf32>,
    %cst_32 = arith.constant 3.906250e-03 : f32
    %58 = vector.broadcast %cst_32 : f32 to vector<1x256xf32>
    %cst_33 = arith.constant dense<0.000000e+00> : vector<1x16xf32>
    %59 = tpu.matmul %58, %37, %cst_33 {dimension_numbers = #tpu.dot_dimension_numbers<[1], [1], [0], [0], [0, 0, 1, 0], [], []>} : vector<1x256xf32>, vector<16x256xf32>, vector<1x16xf32> -> vector<1x16xf32>
    %cst_34 = arith.constant dense<0.000000e+00> : vector<1x16xf32>
    %60 = tpu.matmul %59, %49, %cst_34 {dimension_numbers = #tpu.dot_dimension_numbers<[1], [1], [0], [0], [0, 0, 1, 0], [], []>} : vector<1x16xf32>, vector<16x16xf32>, vector<1x16xf32> -> vector<1x16xf32>
    %c0_35 = arith.constant 0 : index
    %c0_36 = arith.constant 0 : index
    %61 = vector.load %arg9[%c0_35, %c0_36] : memref<16x32xf32, #tpu.memory_space<vmem>>, vector<16x32xf32>
    %cst_37 = arith.constant dense<0.000000e+00> : vector<1x32xf32>
    %62 = tpu.matmul %60, %61, %cst_37 {dimension_numbers = #tpu.dot_dimension_numbers<[1], [0], [0], [1], [0, 0, 1, 1], [], []>} : vector<1x16xf32>, vector<16x32xf32>, vector<1x32xf32> -> vector<1x32xf32>
    %c0_38 = arith.constant 0 : index
    %c0_39 = arith.constant 0 : index
    %63 = vector.load %arg10[%c0_38, %c0_39] : memref<1x32xf32, #tpu.memory_space<vmem>>, vector<1x32xf32>
    %64 = arith.mulf %62, %63 : vector<1x32xf32>
    %c0_40 = arith.constant 0 : index
    %c0_41 = arith.constant 0 : index
    %65 = vector.load %arg11[%c0_40, %c0_41] : memref<1x32xf32, #tpu.memory_space<vmem>>, vector<1x32xf32>
    %66 = arith.addf %64, %65 : vector<1x32xf32>
    %cst_42 = arith.constant 0.000000e+00 : f32
    %67 = vector.broadcast %cst_42 : f32 to vector<1x32xf32>
    %68 = arith.maximumf %66, %67 : vector<1x32xf32>
    %c0_43 = arith.constant 0 : index
    %c0_44 = arith.constant 0 : index
    %69 = vector.load %arg12[%c0_43, %c0_44] : memref<32x8xf32, #tpu.memory_space<vmem>>, vector<32x8xf32>
    %cst_45 = arith.constant dense<0.000000e+00> : vector<1x8xf32>
    %70 = tpu.matmul %68, %69, %cst_45 {dimension_numbers = #tpu.dot_dimension_numbers<[1], [0], [0], [1], [0, 0, 1, 1], [], []>} : vector<1x32xf32>, vector<32x8xf32>, vector<1x8xf32> -> vector<1x8xf32>
    %c0_46 = arith.constant 0 : index
    %c0_47 = arith.constant 0 : index
    %71 = vector.load %arg13[%c0_46, %c0_47] : memref<1x8xf32, #tpu.memory_space<vmem>>, vector<1x8xf32>
    %72 = arith.addf %70, %71 : vector<1x8xf32>
    %c0_48 = arith.constant 0 : index
    %c0_49 = arith.constant 0 : index
    %73 = vector.load %arg14[%c0_48, %c0_49] : memref<8x8xf32, #tpu.memory_space<vmem>>, vector<8x8xf32>
    %74 = vector.broadcast %72 : vector<1x8xf32> to vector<8x8xf32>
    %75 = arith.mulf %73, %74 : vector<8x8xf32>
    %c0_50 = arith.constant 0 : index
    %c0_51 = arith.constant 0 : index
    %76 = vector.load %arg15[%c0_50, %c0_51] : memref<8x8xf32, #tpu.memory_space<vmem>>, vector<8x8xf32>
    %77 = arith.addf %75, %76 : vector<8x8xf32>
    %cst_52 = arith.constant dense<0.000000e+00> : vector<8x256xf32>
    %78 = tpu.matmul %77, %1, %cst_52 {dimension_numbers = #tpu.dot_dimension_numbers<[1], [0], [0], [1], [0, 0, 1, 1], [], []>} : vector<8x8xf32>, vector<8x256xf32>, vector<8x256xf32> -> vector<8x256xf32>
    %c0_53 = arith.constant 0 : index
    %c0_54 = arith.constant 0 : index
    %79 = vector.load %arg16[%c0_53, %c0_54] : memref<8x1xf32, #tpu.memory_space<vmem>>, vector<8x1xf32>
    %80 = vector.broadcast %79 : vector<8x1xf32> to vector<8x256xf32>
    %81 = arith.mulf %78, %80 : vector<8x256xf32>
    %c0_55 = arith.constant 0 : index
    %c0_56 = arith.constant 0 : index
    %82 = vector.load %arg17[%c0_55, %c0_56] : memref<8x1xf32, #tpu.memory_space<vmem>>, vector<8x1xf32>
    %83 = vector.broadcast %82 : vector<8x1xf32> to vector<8x256xf32>
    %84 = arith.addf %81, %83 : vector<8x256xf32>
    %cst_57 = arith.constant 0.000000e+00 : f32
    %85 = vector.broadcast %cst_57 : f32 to vector<8x256xf32>
    %86 = arith.maximumf %84, %85 : vector<8x256xf32>
    %c0_58 = arith.constant 0 : index
    %c0_59 = arith.constant 0 : index
    %c0_60 = arith.constant 0 : index
    %87 = vector.load %arg18[%c0_58, %c0_59, %c0_60] : memref<1x8x256xf32, #tpu.memory_space<vmem>>, vector<1x8x256xf32>
    %88 = vector.shape_cast %87 : vector<1x8x256xf32> to vector<8x256xf32>
    %89 = vector.shape_cast %86 : vector<8x256xf32> to vector<1x8x256xf32>
    tpu.vector_store %arg18[%c0_58, %c0_59, %c0_60], %89 {strides = array<i32>} : memref<1x8x256xf32, #tpu.memory_space<vmem>>, vector<1x8x256xf32>,
    return
  }
  func.func @transform_0(%arg0: i32) -> (i32, i32, i32) {
    %c0_i32 = arith.constant 0 : i32
    %c0_i32_0 = arith.constant 0 : i32
    %c0_i32_1 = arith.constant 0 : i32
    return %arg0, %c0_i32, %c0_i32_0 : i32, i32, i32
  }
  func.func @transform_1(%arg0: i32) -> (i32, i32) {
    %c0_i32 = arith.constant 0 : i32
    %c0_i32_0 = arith.constant 0 : i32
    %c0_i32_1 = arith.constant 0 : i32
    return %c0_i32, %c0_i32_0 : i32, i32
  }
  func.func @transform_2(%arg0: i32) -> (i32, i32) {
    %c0_i32 = arith.constant 0 : i32
    %c0_i32_0 = arith.constant 0 : i32
    %c0_i32_1 = arith.constant 0 : i32
    return %c0_i32, %c0_i32_0 : i32, i32
  }
  func.func @transform_3(%arg0: i32) -> (i32, i32) {
    %c0_i32 = arith.constant 0 : i32
    %c0_i32_0 = arith.constant 0 : i32
    %c0_i32_1 = arith.constant 0 : i32
    return %c0_i32, %c0_i32_0 : i32, i32
  }
  func.func @transform_4(%arg0: i32) -> (i32, i32) {
    %c0_i32 = arith.constant 0 : i32
    %c0_i32_0 = arith.constant 0 : i32
    %c0_i32_1 = arith.constant 0 : i32
    return %c0_i32, %c0_i32_0 : i32, i32
  }
  func.func @transform_5(%arg0: i32) -> (i32, i32) {
    %c0_i32 = arith.constant 0 : i32
    %c0_i32_0 = arith.constant 0 : i32
    %c0_i32_1 = arith.constant 0 : i32
    return %c0_i32, %c0_i32_0 : i32, i32
  }
  func.func @transform_6(%arg0: i32) -> (i32, i32) {
    %c0_i32 = arith.constant 0 : i32
    %c0_i32_0 = arith.constant 0 : i32
    %c0_i32_1 = arith.constant 0 : i32
    return %c0_i32, %c0_i32_0 : i32, i32
  }
  func.func @transform_7(%arg0: i32) -> (i32, i32) {
    %c0_i32 = arith.constant 0 : i32
    %c0_i32_0 = arith.constant 0 : i32
    %c0_i32_1 = arith.constant 0 : i32
    return %c0_i32, %c0_i32_0 : i32, i32
  }
  func.func @transform_8(%arg0: i32) -> (i32, i32) {
    %c0_i32 = arith.constant 0 : i32
    %c0_i32_0 = arith.constant 0 : i32
    %c0_i32_1 = arith.constant 0 : i32
    return %c0_i32, %c0_i32_0 : i32, i32
  }
  func.func @transform_9(%arg0: i32) -> (i32, i32) {
    %c0_i32 = arith.constant 0 : i32
    %c0_i32_0 = arith.constant 0 : i32
    %c0_i32_1 = arith.constant 0 : i32
    return %c0_i32, %c0_i32_0 : i32, i32
  }
  func.func @transform_10(%arg0: i32) -> (i32, i32) {
    %c0_i32 = arith.constant 0 : i32
    %c0_i32_0 = arith.constant 0 : i32
    %c0_i32_1 = arith.constant 0 : i32
    return %c0_i32, %c0_i32_0 : i32, i32
  }
  func.func @transform_11(%arg0: i32) -> (i32, i32) {
    %c0_i32 = arith.constant 0 : i32
    %c0_i32_0 = arith.constant 0 : i32
    %c0_i32_1 = arith.constant 0 : i32
    return %c0_i32, %c0_i32_0 : i32, i32
  }
  func.func @transform_12(%arg0: i32) -> (i32, i32) {
    %c0_i32 = arith.constant 0 : i32
    %c0_i32_0 = arith.constant 0 : i32
    %c0_i32_1 = arith.constant 0 : i32
    return %c0_i32, %c0_i32_0 : i32, i32
  }
  func.func @transform_13(%arg0: i32) -> (i32, i32) {
    %c0_i32 = arith.constant 0 : i32
    %c0_i32_0 = arith.constant 0 : i32
    %c0_i32_1 = arith.constant 0 : i32
    return %c0_i32, %c0_i32_0 : i32, i32
  }
  func.func @transform_14(%arg0: i32) -> (i32, i32) {
    %c0_i32 = arith.constant 0 : i32
    %c0_i32_0 = arith.constant 0 : i32
    %c0_i32_1 = arith.constant 0 : i32
    return %c0_i32, %c0_i32_0 : i32, i32
  }
  func.func @transform_15(%arg0: i32) -> (i32, i32) {
    %c0_i32 = arith.constant 0 : i32
    %c0_i32_0 = arith.constant 0 : i32
    %c0_i32_1 = arith.constant 0 : i32
    return %c0_i32, %c0_i32_0 : i32, i32
  }
  func.func @transform_16(%arg0: i32) -> (i32, i32) {
    %c0_i32 = arith.constant 0 : i32
    %c0_i32_0 = arith.constant 0 : i32
    %c0_i32_1 = arith.constant 0 : i32
    return %c0_i32, %c0_i32_0 : i32, i32
  }
  func.func @transform_17(%arg0: i32) -> (i32, i32, i32) {
    %c0_i32 = arith.constant 0 : i32
    %c0_i32_0 = arith.constant 0 : i32
    %c0_i32_1 = arith.constant 0 : i32
    return %arg0, %c0_i32, %c0_i32_0 : i32, i32, i32
  }
  func.func @transform_18(%arg0: i32) -> (i32, i32, i32, i32) {
    %c0_i32 = arith.constant 0 : i32
    %c0_i32_0 = arith.constant 0 : i32
    %c0_i32_1 = arith.constant 0 : i32
    %c0_i32_2 = arith.constant 0 : i32
    return %arg0, %c0_i32, %c0_i32_0, %c0_i32_1 : i32, i32, i32, i32
  }
}

</mosaic_0001>

<bundles_post_ra>
// kernel: tpu_custom_call.1
= control target key start
LH: loop header
LB: loop body
LE: loop exit
PB: predicated region body
PF: predicated region fallthrough
CT: control target
= control target key end

     0   :  { %s1959_s0 = inlined_call_operand.vmem [shape: f32[2,8,256], index: 0, kind: input, shape index: {}]   ;;  %s1960_s1 = inlined_call_operand.vmem [shape: f32[32,8], index: 1, kind: input, shape index: {}]   ;;  %s1961_s2 = inlined_call_operand.vmem [shape: f32[32,1], index: 2, kind: input, shape index: {}]   ;;  %s1962_s3 = inlined_call_operand.vmem [shape: f32[32,1], index: 3, kind: input, shape index: {}]   ;;  %s1963_s4 = inlined_call_operand.vmem [shape: f32[16,32], index: 4, kind: input, shape index: {}]   ;;  %s1964_s5 = inlined_call_operand.vmem [shape: f32[16,1], index: 5, kind: input, shape index: {}]   ;;  %s1965_s6 = inlined_call_operand.vmem [shape: f32[16,16], index: 6, kind: input, shape index: {}]   ;;  %s1966_s7 = inlined_call_operand.vmem [shape: f32[16,16], index: 7, kind: input, shape index: {}]   ;;  %s1967_s8 = inlined_call_operand.vmem [shape: f32[16,32], index: 8, kind: input, shape index: {}]   ;;  %s1968_s9 = inlined_call_operand.vmem [shape: f32[1,32], index: 9, kind: input, shape index: {}]   ;;  %s1969_s10 = inlined_call_operand.vmem [shape: f32[1,32], index: 10, kind: input, shape index: {}]   ;;  %s1970_s11 = inlined_call_operand.vmem [shape: f32[32,8], index: 11, kind: input, shape index: {}]   ;;  %s1971_s12 = inlined_call_operand.vmem [shape: f32[1,8], index: 12, kind: input, shape index: {}]   ;;  %s1972_s13 = inlined_call_operand.vmem [shape: f32[8,8], index: 13, kind: input, shape index: {}]   ;;  %s1973_s14 = inlined_call_operand.vmem [shape: f32[8,8], index: 14, kind: input, shape index: {}]   ;;  %s1974_s15 = inlined_call_operand.vmem [shape: f32[8,1], index: 15, kind: input, shape index: {}]   ;;  %s1975_s16 = inlined_call_operand.vmem [shape: f32[8,1], index: 16, kind: input, shape index: {}]   ;;  %s1976_s17 = inlined_call_operand.hbm [shape: f32[2,8,256], index: 17, kind: output, shape index: {0}]   ;;  %s1977_s18 = inlined_call_operand.hbm [shape: f32[2,2,8,8], index: 18, kind: output, shape index: {1}]  }
   0x1   :  { %1987 = sst [smem:[#allocation14_spill]] %s1959_s0 }
   0x2   :  { %1988 = sst [smem:[#allocation15_spill]] %s1960_s1 }
   0x3   :  { %1989 = sst [smem:[#allocation16_spill]] %s1961_s2 }
   0x4   :  { %1990 = sst [smem:[#allocation17_spill]] %s1962_s3 }
   0x5   :  { %1991 = sst [smem:[#allocation18_spill]] %s1963_s4 }
   0x6   :  { %1992 = sst [smem:[#allocation19_spill]] %s1964_s5 }
   0x7   :  { %1993 = sst [smem:[#allocation20_spill]] %s1965_s6 }
   0x8   :  { %24 = vsyncpa [#allocation3], 0 }
   0x9   :  { %26 = vsyncpa [#allocation3 + $0x1], 0 }
   0xa   :  { %27 = vsyncpa [#allocation5], 0 }
   0xb   :  { %29 = vsyncpa [#allocation5 + $0x1], 0  ;;  %s1661_s27 = smov 0   ;;  %s1663_s28 = smov 0  }
   0xc   :  { %s1665_s29 = smov 0   ;;  %s1667_s30 = smov 0  }
   0xd LB: > { %1994 = sst [smem:[#allocation8_spill]] %s1547_s27  ;;  %s1682_s0 = sadd.s32 4294967295, %s1559_s30   ;;  %s1559_s30 = sphi %s1667_s30, %s2017_s30   ;;  %s1555_s29 = sphi %s1665_s29, %s2019_s29   ;;  %s1551_s28 = sphi %s1663_s28, %s2021_s28   ;;  %s1547_s27 = sphi %s1661_s27, %s2020_s27  }
   0xe   : > { %1995 = sst [smem:[#allocation9_spill]] %s1555_s29  ;;  %s1348_s19 = sadd.s32 4294967294, %s1559_s30  }
   0xf   : > { %1996 = sst [smem:[#allocation10_spill]] %s1559_s30  ;;  %s1686_s1 = sadd.s32 1, %s1559_s30  }
  0x10   : > { %1997 = sst [smem:[#allocation11_spill]] %s1686_s1  ;;  %s404_s20 = sadd.s32 1, %s1555_s29 }
  0x11   : > { %s401_s21 = ssub.s32 %s1559_s30, %s1686_s1  ;;  %p414_p0 = scmp.ne.s32.totalorder %s1555_s29, %s1551_s28 }
  0x12   : > { %p402_p1 = scmp.eq.s32.totalorder %s401_s21, 0  ;;  %p415_p2 = scmp.eq.s32.totalorder %s1682_s0, 1 }
  0x13   : > { %p420_p3 = scmp.ne.s32.totalorder %s1551_s28, %s1547_s27  ;;  %p421_p4 = scmp.eq.s32.totalorder %s1348_s19, 1 }
  0x14   : > { %s1697_s22 = scalar_select %p402_p1, %s1555_s29, %s404_s20  }
  0x15   : > { %p1699_p5 = por %p415_p2, %p414_p0  ;;  %p1703_p6 = por %p421_p4, %p420_p3 }
  0x16   : > { %1998 = sst [smem:[#allocation12_spill]] %s1697_s22  ;;  %p1351_p7 = scmp.ge.s32.totalorder %s1559_s30, 1 }
  0x17   : > { %s2000_s23 = scalar_select %p1703_p6, 1, 0 }
  0x18   : > { %p521_p8 = scmp.lt.s32.totalorder %s1559_s30, 3 }
  0x19   : > { %2001 = sst [smem:[#allocation13_spill]] %s2000_s23 }
  0x1a   : > { %p522_p9 = pnand %p1351_p7, %p521_p8 }
  0x1b   : > { %s2002_s3 = sld [smem:[#allocation17_spill]] (!%p522_p9)  ;;  %p580_p10 = scmp.lt.s32.totalorder (!%p522_p9), %s1682_s0, 1 }
  0x1c   : > { %525 = sbr.rel (%p522_p9) target bundleno = 1134 (0x46e), region = 88  ;;  %s2003_s20 = sld [smem:[#allocation16_spill]] (!%p522_p9) }
  0x1d   : > { %s2004_s23 = sld [smem:[#allocation14_spill]] (!%p522_p9)  ;;  %s1846_s25 = sand.u32 (!%p522_p9), 1, %s1551_s28  }
  0x1e   : > { %s2005_s19 = sld [smem:[#allocation15_spill]] (!%p522_p9)  ;;  %s1986_s22 = sshll.u32 (!%p522_p9), %s1846_s25, 4 }
  0x1f   : > { %s2006_s5 = sld [smem:[#allocation19_spill]] (!%p522_p9)  ;;  %s1857_s30 = scalar_lea.vmem (!%p522_p9), [#allocation4], %s1986_s22 }
  0x20   : > { %s2007_s4 = sld [smem:[#allocation18_spill]] (!%p522_p9)  ;;  %s1563_s29 = smov (!%p522_p9), 120  }
  0x21   : > { %v697_v0 = vld [vmem:[%s2002_s3 + $0x18] sm:$0xff]  ;;  %v1561_v2 = vmov 0   ;;  %s581_s21 = scalar_select %p580_p10, %s1682_s0, 1  ;;  %v696_v3 = vld [vmem:[%s2002_s3 + $0x10] sm:$0xff]  ;;  %vm591_vm0 = vcmask 64512   ;;  %v694_v11 = vld [vmem:[%s2002_s3] sm:$0xff] }
  0x22   : > { %v665_v1 = vld [vmem:[%s2003_s20 + $0x18] sm:$0xff]  ;;  %1439 = vset.pattern.permute.xlu1 %v1561_v2  ;;  %1438 = vset.pattern.permute.xlu0 %v1561_v2  ;;  %v663_v7 = vld [vmem:[%s2003_s20 + $0x8] sm:$0xff]  ;;  %v664_v8 = vld [vmem:[%s2003_s20 + $0x10] sm:$0xff]  ;;  %vm748_vm1 = vcmask 261120   ;;  %s2012_s6 = sld [smem:[#allocation20_spill]] }
  0x23   : > { %715 = vperm.xlu1 %1439, %v697_v0   ;;  %683 = vperm.xlu0 %1438, %v665_v1   ;;  %s1386_s24 = sshll.u32 %s581_s21, 4  ;;  %v662_v9 = vld [vmem:[%s2003_s20] sm:$0xff]  ;;  %v695_v12 = vld [vmem:[%s2002_s3 + $0x8] sm:$0xff]  ;;  %s1223_s3 = scalar_lea.sflag [#allocation5], %s1846_s25 }
  0x24   : > { %1440 = vset.pattern.permute.xlu2 %v1561_v2  ;;  %s584_s27 = scalar_lea.vmem %s2004_s23, %s1386_s24  ;;  %v587_v4 = vld [vmem:[%s2005_s19] sm:$0xff]  ;;  %v588_v10 = vld [vmem:[%s2005_s19 + $0x8] sm:$0xff]  ;;  %v589_v14 = vld [vmem:[%s2005_s19 + $0x10] sm:$0xff]  ;;  %s1250_s23 = sshll.u32 %s1857_s30, 4  ;;  %s1251_s23 = int_to_ptr.vmem [resolvable:$true] %s1250_s23 }
  0x25   : > { %710 = vperm.xlu2 %1440, %v696_v3   ;;  %v1726_v5 = vld [vmem:[%s584_s27] sm:$0xff]  ;;  %v1728_v6 = vld [vmem:[%s584_s27 + $0x8] sm:$0xff]  ;;  %v590_v18 = vld [vmem:[%s2005_s19 + $0x18] sm:$0xff]  ;;  %s1387_s27 = sshll.u32 %s1682_s0, 4 }
  0x26   : > { %619 = vmatpush.msra.mxu0 %v1726_v5  ;;  %648 = vmatpush.msra.mxu1 %v1728_v6  ;;  %v737_v13 = vld [vmem:[%s2006_s5 + $0x8] sm:$0xff]  ;;  %v736_v15 = vld [vmem:[%s2006_s5] sm:$0xff]  ;;  %s1249_s22 = scalar_lea.hbm %s1977_s18, %s1387_s27 }
  0x27   : > { %1356 = vmatmul.msk.f32.vlgmr.msra.gmra.mxu0 %vm591_vm0, %v587_v4  ;;  %1360 = vmatmul.msk.f32.vlgmr.msra.gmra.mxu1 %vm591_vm0, %v587_v4  ;;  %v1197_v16 = vld [vmem:[%s1974_s15] sm:$0xff]  ;;  %v735_v60 = vld [vmem:[%s2007_s4 + $0x8] sm:$0xff] }
  0x28   : > { %v1205_v17 = vld [vmem:[%s1975_s16] sm:$0xff] }
  0x29   : > { %v734_v59 = vld [vmem:[%s2007_s4] sm:$0xff] }
  0x2b   : > { %673 = vperm.xlu1 %1439, %v663_v7   ;;  %678 = vperm.xlu0 %1438, %v664_v8  }
  0x2d   : > { %668 = vperm.xlu2 %1440, %v662_v9  }
  0x2f   : > { %1357 = vmatmul.msk.f32.gmra.mxu0 %vm591_vm0, %v588_v10  ;;  %1361 = vmatmul.msk.f32.gmra.mxu1 %vm591_vm0, %v588_v10 }
  0x33   : > { %700 = vperm.xlu1 %1439, %v694_v11   ;;  %705 = vperm.xlu0 %1438, %v695_v12  }
  0x35   : > { %745 = vperm.xlu2 %1440, %v737_v13  }
  0x37   : > { %1358 = vmatmul.msk.f32.gmra.mxu0 %vm591_vm0, %v589_v14  ;;  %1362 = vmatmul.msk.f32.gmra.mxu1 %vm591_vm0, %v589_v14 }
  0x3b   : > { %740 = vperm.xlu0 %1438, %v736_v15   ;;  %1200 = vperm.xlu1 %1439, %v1197_v16  }
  0x3d   : > { %1208 = vperm.xlu2 %1440, %v1205_v17  }
  0x3f   : > { %1359 = vmatmul.msk.f32.gmra.mxu0 %vm591_vm0, %v590_v18  ;;  %1363 = vmatmul.msk.f32.gmra.mxu1 %vm591_vm0, %v590_v18 }
  0x7f   : > { %v711_v25 = vpop.permute.xlu2 %710 }
  0x87   : > { %v669_v30 = vpop.permute.xlu2 %668 }
  0x8f   : > { %v746_v8 = vpop.permute.xlu2 %745 }
  0x95   : > { %v716_v21 = vpop.permute.xlu1 %715  ;;  %v684_v22 = vpop.permute.xlu0 %683 }
  0x9d   : > { %v674_v28 = vpop.permute.xlu1 %673  ;;  %v679_v29 = vpop.permute.xlu0 %678 }
  0xa4   : > { %v621_v19 = vpop.f32.mrf.mxu0  ;;  %v650_v20 = vpop.f32.mrf.mxu1 }
  0xa5   : > { %v686_v39 = vmul.f32 %v669_v30, %v621_v19  ;;  %v687_v40 = vmul.f32 %v669_v30, %v650_v20  ;;  %v701_v45 = vpop.permute.xlu1 %700  ;;  %v706_v46 = vpop.permute.xlu0 %705 }
  0xa7   : > { %v718_v51 = vadd.f32 %v701_v45, %v686_v39  ;;  %v719_v52 = vadd.f32 %v701_v45, %v687_v40 }
  0xa9   : > { %v726_v57 = vmax.f32 %v718_v51, 0.0  ;;  %v727_v58 = vmax.f32 %v719_v52, 0.0 }
  0xac   : > { %v624_v23 = vpop.f32.mrf.mxu0  ;;  %v653_v24 = vpop.f32.mrf.mxu1 }
  0xad   : > { %v688_v35 = vmul.f32 %v674_v28, %v624_v23  ;;  %v689_v36 = vmul.f32 %v674_v28, %v653_v24  ;;  %v741_v61 = vpop.permute.xlu0 %740 }
  0xaf   : > { %v720_v49 = vadd.f32 %v706_v46, %v688_v35  ;;  %v721_v50 = vadd.f32 %v706_v46, %v689_v36 }
  0xb1   : > { %v728_v55 = vmax.f32 %v720_v49, 0.0  ;;  %v729_v56 = vmax.f32 %v721_v50, 0.0 }
  0xb4   : > { %v627_v26 = vpop.f32.mrf.mxu0  ;;  %v656_v27 = vpop.f32.mrf.mxu1 }
  0xb5   : > { %v690_v31 = vmul.f32 %v679_v29, %v627_v26  ;;  %v691_v32 = vmul.f32 %v679_v29, %v656_v27 }
  0xb7   : > { %v722_v43 = vadd.f32 %v711_v25, %v690_v31  ;;  %v723_v44 = vadd.f32 %v711_v25, %v691_v32 }
  0xb9   : > { %v730_v53 = vmax.f32 %v722_v43, 0.0  ;;  %v731_v54 = vmax.f32 %v723_v44, 0.0 }
  0xbc   : > { %v630_v33 = vpop.f32.mrf.mxu0  ;;  %v659_v34 = vpop.f32.mrf.mxu1 }
  0xbd   : > { %v692_v37 = vmul.f32 %v684_v22, %v630_v33  ;;  %v693_v38 = vmul.f32 %v684_v22, %v659_v34 }
  0xbf   : > { %v724_v41 = vadd.f32 %v716_v21, %v692_v37  ;;  %v725_v42 = vadd.f32 %v716_v21, %v693_v38 }
  0xc1   : > { %v732_v47 = vmax.f32 %v724_v41, 0.0  ;;  %v733_v48 = vmax.f32 %v725_v42, 0.0 }
  0xc3   : > { %767 = vmatpush.msra.mxu2 %v732_v47  ;;  %790 = vmatpush.msra.mxu3 %v733_v48 }
  0xc5   : > { %768 = vmatpush.msra.mxu2 %v730_v53  ;;  %791 = vmatpush.msra.mxu3 %v731_v54 }
  0xc7   : > { %769 = vmatpush.msra.mxu2 %v728_v55  ;;  %792 = vmatpush.msra.mxu3 %v729_v56 }
  0xc9   : > { %770 = vmatpush.msra.mxu2 %v726_v57  ;;  %793 = vmatpush.msra.mxu3 %v727_v58 }
  0xca   : > { %1364 = vmatmul.msk.f32.vlgmr.msra.gmra.mxu2 %vm748_vm1, %v734_v59  ;;  %1366 = vmatmul.msk.f32.vlgmr.msra.gmra.mxu3 %vm748_vm1, %v734_v59 }
  0xd2   : > { %1365 = vmatmul.msk.f32.gmra.mxu2 %vm748_vm1, %v735_v60  ;;  %1367 = vmatmul.msk.f32.gmra.mxu3 %vm748_vm1, %v735_v60 }
 0x14d   : > { %v772_v62 = vpop.f32.mrf.mxu2  ;;  %v795_v63 = vpop.f32.mrf.mxu3 }
 0x14e   : > { %v773_v0 = vadd.f32 %v772_v62, %v741_v61  ;;  %v796_v1 = vadd.f32 %v795_v63, %v741_v61 }
 0x150   : > { %v801_v2 = vrot.slane %v773_v0, 4  ;;  %v807_v3 = vrot.slane %v796_v1, 4 }
 0x152   : > { %v802_v4 = vmax.f32 %v773_v0, %v801_v2  ;;  %v808_v7 = vmax.f32 %v796_v1, %v807_v3 }
 0x154   : > { %v803_v9 = vrot.slane %v802_v4, 2  ;;  %v809_v10 = vrot.slane %v808_v7, 2 }
 0x155   : > { %v775_v11 = vpop.f32.mrf.mxu2  ;;  %v798_v12 = vpop.f32.mrf.mxu3 }
 0x156   : > { %v804_v13 = vmax.f32 %v802_v4, %v803_v9  ;;  %v810_v14 = vmax.f32 %v808_v7, %v809_v10  ;;  %v776_v15 = vadd.f32 %v775_v11, %v746_v8  ;;  %v799_v16 = vadd.f32 %v798_v12, %v746_v8 }
 0x158   : > { %v805_v17 = vrot.slane %v804_v13, 1  ;;  %v811_v18 = vrot.slane %v810_v14, 1  ;;  %v861_v19 = vrot.slane %v776_v15, 4  ;;  %v867_v20 = vrot.slane %v799_v16, 4 }
 0x15a   : > { %v806_v21 = vmax.f32 %v804_v13, %v805_v17  ;;  %v812_v22 = vmax.f32 %v810_v14, %v811_v18  ;;  %v862_v23 = vmax.f32 %v776_v15, %v861_v19  ;;  %v868_v24 = vmax.f32 %v799_v16, %v867_v20 }
 0x15c   : > { %v813_v25 = vsub.f32 %v773_v0, %v806_v21  ;;  %v814_v26 = vsub.f32 %v796_v1, %v812_v22  ;;  %v863_v27 = vrot.slane %v862_v23, 2  ;;  %v869_v28 = vrot.slane %v868_v24, 2 }
 0x15e   : > { %v815_v29 = vmul.f32 1.442695, %v813_v25  ;;  %v817_v30 = vmul.f32 1.442695, %v814_v26  ;;  %v864_v31 = vmax.f32 %v862_v23, %v863_v27  ;;  %v870_v32 = vmax.f32 %v868_v24, %v869_v28 }
 0x160   : > { %1441 = vpow2.f32 %v815_v29  ;;  %v865_v33 = vrot.slane %v864_v31, 1  ;;  %v871_v34 = vrot.slane %v870_v32, 1 }
 0x161   : > { %1443 = vpow2.f32 %v817_v30  ;;  %v1012_v30 = vld [vmem:[%s1966_s7 + $0x8] sm:$0xff] }
 0x162   : > { %v866_v35 = vmax.f32 %v864_v31, %v865_v33  ;;  %v872_v36 = vmax.f32 %v870_v32, %v871_v34 }
 0x164   : > { %v873_v37 = vsub.f32 %v776_v15, %v866_v35  ;;  %v874_v38 = vsub.f32 %v799_v16, %v872_v36 }
 0x166   : > { %v1786_v39 = vpop.eup %1441  ;;  %v875_v40 = vmul.f32 1.442695, %v873_v37  ;;  %v877_v41 = vmul.f32 1.442695, %v874_v38 }
 0x167   : > { %v1788_v42 = vpop.eup %1443  ;;  %v819_v43 = vrot.slane %v1786_v39, 4 }
 0x168   : > { %v825_v44 = vrot.slane %v1788_v42, 4  ;;  %1445 = vpow2.f32 %v875_v40 }
 0x169   : > { %v820_v45 = vadd.f32 %v1786_v39, %v819_v43  ;;  %1447 = vpow2.f32 %v877_v41 }
 0x16a   : > { %v826_v46 = vadd.f32 %v1788_v42, %v825_v44 }
 0x16b   : > { %v821_v47 = vrot.slane %v820_v45, 2 }
 0x16c   : > { %v827_v48 = vrot.slane %v826_v46, 2 }
 0x16d   : > { %v822_v49 = vadd.f32 %v821_v47, %v820_v45 }
 0x16e   : > { %v1794_v50 = vpop.eup %1445  ;;  %v828_v51 = vadd.f32 %v827_v48, %v826_v46 }
 0x16f   : > { %v1796_v52 = vpop.eup %1447  ;;  %v879_v53 = vrot.slane %v1794_v50, 4  ;;  %v823_v54 = vrot.slane %v822_v49, 1 }
 0x170   : > { %v885_v55 = vrot.slane %v1796_v52, 4  ;;  %v829_v56 = vrot.slane %v828_v51, 1 }
 0x171   : > { %v880_v57 = vadd.f32 %v1794_v50, %v879_v53  ;;  %v1801_v58 = vadd.f32 %v823_v54, %v822_v49 }
 0x172   : > { %v886_v59 = vadd.f32 %v1796_v52, %v885_v55  ;;  %v1804_v60 = vadd.f32 %v829_v56, %v828_v51 }
 0x173   : > { %v881_v61 = vrot.slane %v880_v57, 2  ;;  %1449 = vrcp.f32 %v1801_v58  ;;  %vm836_vm2 = vweird.f32 %v1801_v58  ;;  %v840_v18 = vand.u32 2147483647, %v1801_v58 }
 0x174   : > { %v887_v62 = vrot.slane %v886_v59, 2  ;;  %1451 = vrcp.f32 %v1804_v60  ;;  %v842_v21 = vand.u32 2147483648, %v1801_v58  ;;  %vm851_vm4 = vweird.f32 %v1804_v60 }
 0x175   : > { %v882_v63 = vadd.f32 %v881_v61, %v880_v57  ;;  %v855_v34 = vand.u32 2147483647, %v1804_v60  ;;  %v857_v35 = vand.u32 2147483648, %v1804_v60 }
 0x176   : > { %v888_v0 = vadd.f32 %v887_v62, %v886_v59  ;;  %v843_v38 = vor.u32 1.1754944e-38, %v842_v21 }
 0x177   : > { %v883_v1 = vrot.slane %v882_v63, 1  ;;  %v858_v49 = vor.u32 1.1754944e-38, %v857_v35 }
 0x178   : > { %v889_v2 = vrot.slane %v888_v0, 1 }
 0x179   : > { %v1450_v3 = vpop.eup %1449  ;;  %v884_v4 = vadd.f32 %v883_v1, %v882_v63 }
 0x17a   : > { %v1808_v7 = vpop.eup %1451  ;;  %v890_v8 = vadd.f32 %v889_v2, %v888_v0  ;;  %v832_v9 = vmul.f32 %v1450_v3, %v1801_v58  ;;  %vm837_vm3 = vweird.f32 %v1450_v3 }
 0x17b   : > { %1453 = vrcp.f32 %v884_v4  ;;  %v847_v10 = vmul.f32 %v1808_v7, %v1804_v60  ;;  %v900_v22 = vand.u32 2147483647, %v884_v4  ;;  %v902_v23 = vand.u32 2147483648, %v884_v4  ;;  %vm1821_vm8 = vmor %vm836_vm2, %vm837_vm3 }
 0x17c   : > { %1455 = vrcp.f32 %v890_v8  ;;  %v833_v11 = vsub.f32 1.0, %v832_v9  ;;  %vm852_vm5 = vweird.f32 %v1808_v7  ;;  %v917_v26 = vand.u32 2147483648, %v890_v8 }
 0x17d   : > { %v848_v12 = vsub.f32 1.0, %v847_v10  ;;  %v915_v29 = vand.u32 2147483647, %v890_v8  ;;  %vm896_vm9 = vweird.f32 %v884_v4  ;;  %vm1828_vm10 = vmor %vm851_vm4, %vm852_vm5  ;;  %v903_v36 = vor.u32 1.1754944e-38, %v902_v23 }
 0x17e   : > { %v834_v16 = vmul.f32 %v1450_v3, %v833_v11  ;;  %vm911_vm12 = vweird.f32 %v890_v8  ;;  %vm901_vm13 = vcmp.eq.f32.partialorder %v900_v22, 8.507059e+37  ;;  %v918_v41 = vor.u32 1.1754944e-38, %v917_v26 }
 0x17f   : > { %v849_v19 = vmul.f32 %v1808_v7, %v848_v12  ;;  %vm916_vm15 = vcmp.eq.f32.partialorder %v915_v29, 8.507059e+37  ;;  %vm841_vm2 = vcmp.eq.f32.partialorder %v840_v18, 8.507059e+37  ;;  %vm856_vm3 = vcmp.eq.f32.partialorder %v855_v34, 8.507059e+37  ;;  %v1011_v18 = vld [vmem:[%s1966_s7] sm:$0xff] }
 0x180   : > { %v835_v27 = vadd.f32 %v1450_v3, %v834_v16 }
 0x181   : > { %v1454_v13 = vpop.eup %1453  ;;  %v850_v31 = vadd.f32 %v1808_v7, %v849_v19 }
 0x182   : > { %v1456_v14 = vpop.eup %1455  ;;  %v892_v15 = vmul.f32 %v1454_v13, %v884_v4  ;;  %vm897_vm6 = vweird.f32 %v1454_v13  ;;  %v839_v43 = vsel %vm1821_vm8, %v1450_v3, %v835_v27  ;;  %v1008_v27 = vld [vmem:[%s2012_s6 + $0x8] sm:$0xff] }
 0x183   : > { %v907_v17 = vmul.f32 %v1456_v14, %v890_v8  ;;  %vm912_vm7 = vweird.f32 %v1456_v14  ;;  %vm898_vm11 = vmor %vm896_vm9, %vm897_vm6  ;;  %v854_v46 = vsel %vm1828_vm10, %v1808_v7, %v850_v31  ;;  %v844_v53 = vsel %vm841_vm2, %v843_v38, %v839_v43  ;;  %v1122_v43 = vld [vmem:[%s1970_s11 + $0x8] sm:$0xff] }
 0x184   : > { %v893_v20 = vsub.f32 1.0, %v892_v15  ;;  %vm913_vm14 = vmor %vm911_vm12, %vm912_vm7  ;;  %v859_v54 = vsel %vm856_vm3, %v858_v49, %v854_v46  ;;  %v845_v55 = vmul.f32 %v1786_v39, %v844_v53  ;;  %vm1062_vm12 = vcmask 130048   ;;  %v1125_v53 = vld [vmem:[%s1971_s12] sm:$0x1] }
 0x185   : > { %v908_v24 = vsub.f32 1.0, %v907_v17  ;;  %v860_v56 = vmul.f32 %v1788_v42, %v859_v54 }
 0x186   : > { %v894_v25 = vmul.f32 %v1454_v13, %v893_v20 }
 0x187   : > { %v909_v28 = vmul.f32 %v1456_v14, %v908_v24 }
 0x188   : > { %v895_v32 = vadd.f32 %v1454_v13, %v894_v25 }
 0x189   : > { %v910_v37 = vadd.f32 %v1456_v14, %v909_v28 }
 0x18a   : > { %v899_v40 = vsel %vm898_vm11, %v1454_v13, %v895_v32 }
 0x18b   : > { %v904_v44 = vsel %vm901_vm13, %v903_v36, %v899_v40  ;;  %v914_v45 = vsel %vm913_vm14, %v1456_v14, %v910_v37  ;;  %v1007_v14 = vld [vmem:[%s2012_s6] sm:$0xff]  ;;  %v1092_v36 = vld [vmem:[%s1967_s8 + $0x8] sm:$0xff] }
 0x18c   : > { %v905_v47 = vmul.f32 %v1794_v50, %v904_v44  ;;  %v919_v48 = vsel %vm916_vm15, %v918_v41, %v914_v45  ;;  %v1562_v50 = vmov 0.00390625   ;;  %v1091_v37 = vld [vmem:[%s1967_s8] sm:$0xff]  ;;  %v1123_v41 = vld [vmem:[%s1970_s11 + $0x10] sm:$0xff] }
 0x18d   : > { %v920_v51 = vmul.f32 %v1796_v52, %v919_v48  ;;  %v1121_v44 = vld [vmem:[%s1970_s11] sm:$0xff] }
 0x18e   : > { %935 = vmatpush.xpose.msrb.mxu2 %v905_v47  ;;  %1036 = vmatpush.xpose.msrb.mxu0 %v905_v47  ;;  %v1116_v45 = vld [vmem:[%s1968_s9] sm:$0x1] }
 0x18f   : > { %958 = vmatpush.xpose.msrb.mxu3 %v920_v51  ;;  %1056 = vmatpush.xpose.msrb.mxu1 %v920_v51 }
 0x192   : > { %936 = vmatpush.xpose.msrb.mxu2 %v845_v55  ;;  %1037 = vmatpush.xpose.msrb.mxu0 %v845_v55 }
 0x193   : > { %959 = vmatpush.xpose.msrb.mxu3 %v860_v56  ;;  %1057 = vmatpush.xpose.msrb.mxu1 %v860_v56 }
 0x195   : > { %937 = vmatmul.f32.vlgmr.msrb.gmra.mxu2 %v845_v55  ;;  %1038 = vmatmul.f32.vlgmr.msrb.gmra.mxu0 %v1562_v50 }
 0x196   : > { %960 = vmatmul.f32.vlgmr.msrb.gmra.mxu3 %v860_v56  ;;  %1058 = vmatmul.f32.vlgmr.msrb.gmra.mxu1 %v1562_v50  ;;  %v1149_v56 = vld [vmem:[%s1972_s13] sm:$0xff] }
 0x197   : > { %1172 = vmatpush.msra.mxu1 %v1726_v5  ;;  %1110 = vmatpush.msra.mxu3 %v1092_v36 }
 0x199   : > { %1111 = vmatpush.msra.mxu3 %v1091_v37 }
 0x19d   : > { %940 = vmatmul.f32.gmra.mxu2 %v905_v47  ;;  %v1118_v47 = vld [vmem:[%s1969_s10] sm:$0x1] }
 0x19e   : > { %963 = vmatmul.f32.gmra.mxu3 %v920_v51 }
 0x212   : > { %v1039_v33 = vpop.f32.mrf.mxu0 }
 0x213   : > { %v1059_v34 = vpop.f32.mrf.mxu1 }
 0x214   : > { %v1060_v35 = vadd.f32 %v1059_v34, %v1039_v33 }
 0x218   : > { %v938_v52 = vpop.f32.mrf.mxu2 }
 0x219   : > { %v961_v57 = vpop.f32.mrf.mxu3 }
 0x21a   : > { %v962_v58 = vadd.f32 %v961_v57, %v938_v52  ;;  %v1152_v52 = vld [vmem:[%s1973_s14] sm:$0xff] }
 0x21c   : > { %v967_v59 = vmax.f32 %v962_v58, 0.0 }
 0x21e   : > { %v1368_v39 = vmul.f32 -1.442695, %v967_v59 }
 0x220   : > { %1457 = vpow2.f32 %v1368_v39  ;;  %v941_v42 = vpop.f32.mrf.mxu2 }
 0x221   : > { %v964_v60 = vpop.f32.mrf.mxu3 }
 0x222   : > { %v965_v61 = vadd.f32 %v964_v60, %v941_v42 }
 0x224   : > { %v968_v62 = vmax.f32 %v965_v61, 0.0 }
 0x226   : > { %v1458_v63 = vpop.eup %1457  ;;  %v1369_v5 = vmul.f32 -1.442695, %v968_v62 }
 0x227   : > { %v975_v0 = vadd.f32 1.0, %v1458_v63 }
 0x228   : > { %1459 = vpow2.f32 %v1369_v5 }
 0x229   : > { %1461 = vrcp.f32 %v975_v0  ;;  %v988_v8 = vand.u32 2147483648, %v975_v0  ;;  %v986_v10 = vand.u32 2147483647, %v975_v0  ;;  %vm982_vm5 = vweird.f32 %v975_v0 }
 0x22b   : > { %v989_v13 = vor.u32 1.1754944e-38, %v988_v8  ;;  %vm987_vm7 = vcmp.eq.f32.partialorder %v986_v10, 8.507059e+37 }
 0x22e   : > { %v1460_v1 = vpop.eup %1459 }
 0x22f   : > { %v1462_v2 = vpop.eup %1461  ;;  %v976_v3 = vadd.f32 1.0, %v1460_v1 }
 0x230   : > { %v978_v4 = vmul.f32 %v1462_v2, %v975_v0  ;;  %vm983_vm4 = vweird.f32 %v1462_v2 }
 0x231   : > { %1463 = vrcp.f32 %v976_v3  ;;  %vm984_vm6 = vmor %vm982_vm5, %vm983_vm4  ;;  %v1003_v21 = vand.u32 2147483648, %v976_v3  ;;  %v1001_v23 = vand.u32 2147483647, %v976_v3  ;;  %vm997_vm9 = vweird.f32 %v976_v3 }
 0x232   : > { %v979_v7 = vsub.f32 1.0, %v978_v4 }
 0x233   : > { %v1004_v26 = vor.u32 1.1754944e-38, %v1003_v21  ;;  %vm1002_vm11 = vcmp.eq.f32.partialorder %v1001_v23, 8.507059e+37 }
 0x234   : > { %v980_v9 = vmul.f32 %v1462_v2, %v979_v7 }
 0x236   : > { %v981_v11 = vadd.f32 %v1462_v2, %v980_v9 }
 0x237   : > { %v1464_v12 = vpop.eup %1463 }
 0x238   : > { %v993_v15 = vmul.f32 %v1464_v12, %v976_v3  ;;  %v985_v16 = vsel %vm984_vm6, %v1462_v2, %v981_v11  ;;  %vm998_vm8 = vweird.f32 %v1464_v12 }
 0x239   : > { %v990_v17 = vsel %vm987_vm7, %v989_v13, %v985_v16  ;;  %vm999_vm10 = vmor %vm997_vm9, %vm998_vm8 }
 0x23a   : > { %v994_v19 = vsub.f32 1.0, %v993_v15  ;;  %v1009_v20 = vmul.f32 %v1007_v14, %v990_v17 }
 0x23c   : > { %v995_v22 = vmul.f32 %v1464_v12, %v994_v19  ;;  %v1013_v24 = vadd.f32 %v1011_v18, %v1009_v20 }
 0x23e   : > { %v996_v25 = vadd.f32 %v1464_v12, %v995_v22  ;;  %1015 = vst.msk [vmem:[%s1857_s30] sm:$0xff] %vm591_vm0, %v1013_v24 }
 0x240   : > { %v1000_v28 = vsel %vm999_vm10, %v1464_v12, %v996_v25 }
 0x241   : > { %v1005_v29 = vsel %vm1002_vm11, %v1004_v26, %v1000_v28 }
 0x242   : > { %v1010_v31 = vmul.f32 %v1008_v27, %v1005_v29 }
 0x244   : > { %v1014_v32 = vadd.f32 %v1012_v30, %v1010_v31 }
 0x246   : > { %1017 = vrot.lane.b32.xlu0 %v1014_v32, %s1563_s29  ;;  %1371 = vmatpush.xpose.msk.msra.mxu2 %vm1062_vm12, %v1014_v32  ;;  %s1252_s29 = sshll.u32 %s1249_s22, 4  ;;  %s1253_s29 = int_to_ptr.hbm [resolvable:$true] %s1252_s29 }
 0x247   : > { %s1479_s4 = sshra.s32 %s1253_s29, 4  ;;  %s1480_s4 = int_to_ptr.hbm [resolvable:$true] %s1479_s4 }
 0x248   : > { %s1481_s21 = scalar_lea.hbm %s1480_s4, 16  ;;  %p1486_p0 = scmp.lt.s32.totalorder %s1480_s4, %s1977_s18 }
 0x249   : > { %p1482_p11 = scmp.ne.s32.totalorder %s1480_s4, %s1481_s21 }
 0x24a   : > { %1372 = vmatpush.xpose.msk.msra.mxu2 %vm1062_vm12, %v1013_v24 }
 0x24b   : > { %p1483_p12 = pnand %p1482_p11, %p1699_p5 }
 0x24d   : > { %1373 = vmatmul.msk.f32.vlgmr.msra.gmra.mxu2 %vm1062_vm12, %v1060_v35  ;;  %p1484_p13 = pneg %p1483_p12 }
 0x24e   : > { %1192 = vmatpush.msrb.mxu2 %v1728_v6  ;;  %v1124_v6 = vld [vmem:[%s1970_s11 + $0x18] sm:$0xff] }
 0x24f   : > { %1141 = vmatpush.msra.mxu0 %v1124_v6 }
 0x251   : > { %1142 = vmatpush.msra.mxu0 %v1123_v41 }
 0x253   : > { %1143 = vmatpush.msra.mxu0 %v1122_v43 }
 0x255   : > { %1144 = vmatpush.msra.mxu0 %v1121_v44 }
 0x2b8   : > { %v1018_v38 = vpop.permute.xlu0 %1017 }
 0x2b9   : > { %1370 = vst.msk [vmem:[%s1857_s30 + $0x8] sm:$0xff] %vm591_vm0, %v1018_v38  ;;  %s1485_s30 = scalar_lea.hbm %s1977_s18, 32 }
 0x2ba   : > { %p1487_p1 = scmp.lt.s32.totalorder %s1485_s30, %s1481_s21 }
 0x2bc   : > { %p1488_p2 = por %p1487_p1, %p1486_p0 }
 0x2be   : > { %p1489_p3 = pnand %p1488_p2, %p1484_p13 }
 0x2d0   : > { %v1088_v40 = vpop.f32.mrf.mxu2 }
 0x2d1   : > { %1374 = vmatmul.msk.f32.vlgmr.msra.gmra.mxu3 %vm1062_vm12, %v1088_v40 }
 0x354   : > { %v1113_v46 = vpop.f32.mrf.mxu3 }
 0x355   : > { %v1117_v48 = vmul.f32 %v1116_v45, %v1113_v46 }
 0x357   : > { %v1119_v49 = vadd.f32 %v1118_v47, %v1117_v48 }
 0x359   : > { %v1120_v51 = vmax.f32 %v1119_v49, 0.0 }
 0x35b   : > { %1375 = vmatmul.msk.f32.vlgmr.msra.gmra.mxu0 %vm748_vm1, %v1120_v51 }
 0x3d8   : > { %v1146_v54 = vpop.f32.mrf.mxu0 }
 0x3d9   : > { %v1147_v55 = vadd.f32 %v1146_v54, %v1125_v53 }
 0x3db   : > { %v1150_v50 = vperm.slane %v1147_v55, 0 }
 0x3dd   : > { %v1151_v57 = vmul.f32 %v1150_v50, %v1149_v56 }
 0x3df   : > { %v1153_v58 = vadd.f32 %v1152_v52, %v1151_v57 }
 0x3e1   : > { %1376 = vmatmul.msk.f32.vlgmr.msra.gmra.mxu1 %vm591_vm0, %v1153_v58  ;;  %1377 = vmatmul.msk.f32.vlgmr.msrb.gmra.mxu2 %vm591_vm0, %v1153_v58 }
 0x3e2   : > { %1492 = shalt.err (!%p1489_p3)
}
 0x3e3   : > { %s1564_s24 = smov 128   ;;  %s1565_s26 = smov 8   ;;  %v1201_v59 = vpop.permute.xlu1 %1200  ;;  %v1209_v60 = vpop.permute.xlu2 %1208 }
 0x3e4   : > { %1390 = dma.vmem_to_hbm [thread:$0]  (%p1699_p5), %s1251_s23, 256, %s1253_s29, %s1223_s3, %s1564_s24, %s1564_s24, %s1565_s26  }
 0x3e5   : > { %s1234_s22 = scalar_lea.hbm %s1976_s17, %s1387_s27  ;;  %s2013_s4 = sshll.u32 %s1846_s25, 4 }
 0x3e6   : > { %s572_s21 = scalar_lea.vmem [#allocation2], %s2013_s4  ;;  %s1238_s30 = sshll.u32 %s1234_s22, 4  ;;  %s1239_s30 = int_to_ptr.hbm [resolvable:$true] %s1238_s30 }
 0x3e7   : > { %s1236_s1 = sshll.u32 %s572_s21, 4  ;;  %s1218_s23 = scalar_lea.sflag [#allocation3], %s1846_s25  ;;  %s1237_s1 = int_to_ptr.vmem [resolvable:$true] %s1236_s1 }
 0x3e8   : > { %s1507_s29 = sshra.s32 %s1239_s30, 4  ;;  %s1513_s24 = scalar_lea.hbm %s1976_s17, 32  ;;  %s1508_s29 = int_to_ptr.hbm [resolvable:$true] %s1507_s29 }
 0x3e9   : > { %s1509_s3 = scalar_lea.hbm %s1508_s29, 16  ;;  %p1514_p9 = scmp.lt.s32.totalorder %s1508_s29, %s1976_s17 }
 0x3ea   : > { %p1510_p4 = scmp.ne.s32.totalorder %s1508_s29, %s1509_s3  ;;  %p1515_p10 = scmp.lt.s32.totalorder %s1513_s24, %s1509_s3 }
 0x3ec   : > { %p1511_p7 = pnand %p1510_p4, %p1699_p5  ;;  %p1516_p11 = por %p1515_p10, %p1514_p9 }
 0x3ee   : > { %p1512_p8 = pneg %p1511_p7 }
 0x3f0   : > { %p1517_p12 = pnand %p1516_p11, %p1512_p8 }
 0x45e   : > { %v1174_v39 = vpop.f32.mrf.mxu1 }
 0x45f   : > { %v1203_v42 = vmul.f32 %v1201_v59, %v1174_v39 }
 0x461   : > { %v1211_v61 = vadd.f32 %v1209_v60, %v1203_v42 }
 0x463   : > { %v1213_v62 = vmax.f32 %v1211_v61, 0.0 }
 0x464   : > { %v1194_v63 = vpop.f32.mrf.mxu2 }
 0x465   : > { %1215 = vst [vmem:[%s572_s21] sm:$0xff] %v1213_v62  ;;  %v1204_v5 = vmul.f32 %v1201_v59, %v1194_v63 }
 0x467   : > { %v1212_v0 = vadd.f32 %v1209_v60, %v1204_v5 }
 0x469   : > { %v1214_v1 = vmax.f32 %v1212_v0, 0.0 }
 0x46b   : > { %1216 = vst [vmem:[%s572_s21 + $0x8] sm:$0xff] %v1214_v1 }
 0x46c   : > { %1520 = shalt.err (!%p1517_p12)
}
 0x46d   : > { %1389 = dma.vmem_to_hbm [thread:$0]  (%p1699_p5), %s1237_s1, 256, %s1239_s30, %s1218_s23  }
 0x46e PF: > { %s2014_s25 = sld [smem:[#allocation10_spill]] }
 0x46f   : > { %s2015_s6 = sld [smem:[#allocation8_spill]] }
 0x474   : > { %p1400_p13 = scmp.ge.s32.totalorder %s2014_s25, 2 }
 0x475   : > { %s1267_s4 = sand.u32 1, %s2015_s6  }
 0x476   : > { %p1394_p0 = pnand %p1400_p13, %p1703_p6  ;;  %s1268_s21 = scalar_lea.sflag [#allocation3], %s1267_s4 }
 0x478   : > { %p1395_p1 = pneg %p1394_p0 }
 0x47a   : > { %1538 = dma.done.wait (%p1395_p1), %s1268_s21, 256  }
 0x47b   : > { %1540 = vsyncadd (%p1395_p1), %s1268_s21, 4294967040  ;;  %s1278_s29 = scalar_lea.sflag [#allocation5], %s1267_s4 }
 0x47c   : > { %1542 = dma.done.wait (%p1395_p1), %s1278_s29, 256  }
 0x47d   : > { %1544 = vsyncadd (%p1395_p1), %s1278_s29, 4294967040  ;;  %s2017_s30 = sld [smem:[#allocation11_spill]]  ;;  %s2020_s27 = smov %s1551_s28 }
 0x47e   : > { %s2018_s3 = sld [smem:[#allocation9_spill]] }
 0x47f   : > { %s2019_s29 = sld [smem:[#allocation12_spill]] }
 0x483   : > { %p32_p5 = scmp.ge.s32.totalorder %s2017_s30, 4  }
 0x484   : > { %s2021_s28 = smov %s2018_s3 }
 0x485   :  { %34 = sbr.rel (!%p32_p5) target bundleno = 13 (0xd), region = 141 }
 0x48a   :  { %1284 = vsyncpa [#allocation3], 1 }
 0x48b   :  { %1286 = vsyncpa [#allocation3 + $0x1], 1 }
 0x48c   :  { %1287 = vsyncpa [#allocation5], 1 }
 0x48d   :  { %1289 = vsyncpa [#allocation5 + $0x1], 1 }

</bundles_post_ra>
